<compile_context>
chip_gen: v7x
topology: tpu7x:2x2x1
jax: 0.10.0
libtpu: 0.0.40
codegen_flags: <defaults>
</compile_context>

<pallas_src>
import functools

import jax
import jax.numpy as jnp
from jax.experimental import pallas as pl
from jax.experimental.pallas import tpu as pltpu


H1, H2 = 400, 300      # true hidden widths (PyTorch spec)
H1P, H2P = 512, 384    # lane-dense padded widths (multiples of 128)
_LN_EPS = 1e-5


def _round_up(n, m):
    return ((n + m - 1) // m) * m


# ----------------------------- kernels -------------------------------------


def _actor_kernel(ma_ref, x_ref, w1_ref, b1_ref, w2_ref, b2_ref, w3_ref, b3_ref,
                  o_ref):
    max_action = ma_ref[0]
    x = x_ref[...].astype(jnp.bfloat16)
    h1 = jnp.tanh(
        jnp.dot(x, w1_ref[...], preferred_element_type=jnp.float32) + b1_ref[...])
    h2 = jnp.tanh(
        jnp.dot(h1.astype(jnp.bfloat16), w2_ref[...],
                preferred_element_type=jnp.float32) + b2_ref[...])
    h3 = jnp.dot(h2.astype(jnp.bfloat16), w3_ref[...],
                 preferred_element_type=jnp.float32) + b3_ref[...]
    o_ref[...] = (max_action * jnp.tanh(h3)).astype(o_ref.dtype)


def _masked_layer_norm(h, g, b, n_true, n_pad):
    # Feature columns [n_true:n_pad] of `h` are exactly zero (weights & biases
    # are zero-padded), so statistics over the true n_true features can be
    # recovered without an explicit mask:
    #   mean = sum(h) / n_true                  (padded cols add 0 to the sum)
    #   var  = (sum((h-mean)^2) - n_zero * mean^2) / n_true
    mean = jnp.sum(h, axis=-1, keepdims=True) * (1.0 / n_true)
    centered = h - mean
    sq = jnp.sum(jnp.square(centered), axis=-1, keepdims=True)
    var = (sq - (n_pad - n_true) * jnp.square(mean)) * (1.0 / n_true)
    inv = jax.lax.rsqrt(var + _LN_EPS)
    # gamma/beta are zero on padded cols -> padded outputs stay exactly 0,
    # so they contribute nothing to the next matmul.  Fold gamma into inv.
    return centered * (inv * g) + b


def _actor_ln_kernel(ma_ref, x_ref, w1_ref, b1_ref, w2_ref, b2_ref, w3_ref, b3_ref,
                     g1_ref, be1_ref, g2_ref, be2_ref, o_ref):
    max_action = ma_ref[0]
    x = x_ref[...].astype(jnp.bfloat16)
    h1 = jnp.dot(x, w1_ref[...], preferred_element_type=jnp.float32) + b1_ref[...]
    h1 = jnp.tanh(_masked_layer_norm(h1, g1_ref[...], be1_ref[...],
                                     float(H1), float(H1P)))
    h2 = jnp.dot(h1.astype(jnp.bfloat16), w2_ref[...],
                 preferred_element_type=jnp.float32) + b2_ref[...]
    h2 = jnp.tanh(_masked_layer_norm(h2, g2_ref[...], be2_ref[...],
                                     float(H2), float(H2P)))
    h3 = jnp.dot(h2.astype(jnp.bfloat16), w3_ref[...],
                 preferred_element_type=jnp.float32) + b3_ref[...]
    o_ref[...] = (max_action * jnp.tanh(h3)).astype(o_ref.dtype)


# ----------------------------- wrapper --------------------------------------


def actor_forward(x, packed, max_action, action_dim, layer_norm=False,
                  block_b=256):
    """Pallas forward pass. x: [B, state_dim] float32; packed from pack_actor_params."""
    B, state_dim = x.shape
    ap = packed["w3"].shape[1]                     # padded action width (mult of 128)

    tb = min(block_b, _round_up(B, 8))             # batch tile, multiple of 8
    b_pad = _round_up(B, tb)
    if b_pad != B:
        x = jnp.pad(x, ((0, b_pad - B), (0, 0)))

    ma = jnp.asarray([max_action], jnp.float32)    # SMEM scalar: no recompile/value

    def _resident2d(a):
        # Full-array block, constant block index -> stays in VMEM across steps.
        return pl.BlockSpec(a.shape, lambda i: (0, 0))

    args = [ma, x, packed["w1"], packed["b1"], packed["w2"], packed["b2"],
            packed["w3"], packed["b3"]]
    in_specs = [pl.BlockSpec(memory_space=pltpu.MemorySpace.SMEM),
                pl.BlockSpec((tb, state_dim), lambda i: (i, 0))]
    in_specs += [_resident2d(a) for a in args[2:]]
    kernel = _actor_kernel

    if layer_norm:
        ln_args = [packed["n1_w"], packed["n1_b"], packed["n2_w"], packed["n2_b"]]
        args += ln_args
        in_specs += [_resident2d(a) for a in ln_args]
        kernel = _actor_ln_kernel

    out = pl.pallas_call(
        kernel,
        out_shape=jax.ShapeDtypeStruct((b_pad, ap), jnp.float32),
        grid=(b_pad // tb,),
        in_specs=in_specs,
        out_specs=pl.BlockSpec((tb, ap), lambda i: (i, 0)),
        compiler_params=pltpu.CompilerParams(
            dimension_semantics=("parallel",)),
    )(*args)
    return out[:B, :action_dim]


# ----------------------------- params ---------------------------------------


def init_actor_params(key, state_dim, action_dim, layer_norm=False):
    """nn.Linear-style init (uniform +-1/sqrt(fan_in)), float32, unpadded."""
    dims = [(state_dim, H1), (H1, H2), (H2, action_dim)]
    params = {}
    keys = jax.random.split(key, 6)
    for i, (fan_in, fan_out) in enumerate(dims, start=1):
        bound = 1.0 / float(fan_in) ** 0.5
        params[f"w{i}"] = jax.random.uniform(
            keys[2 * (i - 1)], (fan_in, fan_out), jnp.float32, -bound, bound)
        params[f"b{i}"] = jax.random.uniform(
            keys[2 * (i - 1) + 1], (1, fan_out), jnp.float32, -bound, bound)
    if layer_norm:
        params["n1_w"] = jnp.ones((1, H1), jnp.float32)
        params["n1_b"] = jnp.zeros((1, H1), jnp.float32)
        params["n2_w"] = jnp.ones((1, H2), jnp.float32)
        params["n2_b"] = jnp.zeros((1, H2), jnp.float32)
    return params


def pack_actor_params(params, layer_norm=False):
    """Zero-pad feature dims to lane-dense widths; weights stored bf16."""
    action_dim = params["w3"].shape[1]
    ap = _round_up(action_dim, 128)

    def pad2(a, rows, cols, dtype=None):
        out = jnp.pad(a, ((0, rows - a.shape[0]), (0, cols - a.shape[1])))
        return out.astype(dtype) if dtype is not None else out

    packed = {
        "w1": pad2(params["w1"], params["w1"].shape[0], H1P, jnp.bfloat16),
        "b1": pad2(params["b1"], 1, H1P),
        "w2": pad2(params["w2"], H1P, H2P, jnp.bfloat16),
        "b2": pad2(params["b2"], 1, H2P),
        "w3": pad2(params["w3"], H2P, ap, jnp.bfloat16),
        "b3": pad2(params["b3"], 1, ap),
    }
    if layer_norm:
        packed["n1_w"] = pad2(params["n1_w"], 1, H1P)
        packed["n1_b"] = pad2(params["n1_b"], 1, H1P)
        packed["n2_w"] = pad2(params["n2_w"], 1, H2P)
        packed["n2_b"] = pad2(params["n2_b"], 1, H2P)
    return packed


# ----------------------------- reference + main ------------------------------


def actor_reference(x, params, max_action, layer_norm=False):
    """Pure-f32 reference matching the PyTorch module."""
    def ln(h, g, b):
        m = h.mean(-1, keepdims=True)
        v = ((h - m) ** 2).mean(-1, keepdims=True)
        return (h - m) / jnp.sqrt(v + _LN_EPS) * g + b

    h = x @ params["w1"] + params["b1"]
    if layer_norm:
        h = ln(h, params["n1_w"], params["n1_b"])
    h = jnp.tanh(h)
    h = h @ params["w2"] + params["b2"]
    if layer_norm:
        h = ln(h, params["n2_w"], params["n2_b"])
    h = jnp.tanh(h)
    return max_action * jnp.tanh(h @ params["w3"] + params["b3"])


if __name__ == "__main__":
    key = jax.random.PRNGKey(0)
    state_dim, action_dim, max_action = 17, 6, 2.0
    batch = 2

    k_param, k_param_ln, k_x = jax.random.split(key, 3)
    x = jax.random.normal(k_x, (batch, state_dim), jnp.float32)

    ok = True
    for layer_norm, pkey in ((False, k_param), (True, k_param_ln)):
        params = init_actor_params(pkey, state_dim, action_dim, layer_norm)
        packed = pack_actor_params(params, layer_norm)
        out = actor_forward(x, packed, max_action, action_dim,
                            layer_norm=layer_norm)
        out = jax.block_until_ready(out)
        ref = actor_reference(x, params, max_action, layer_norm=layer_norm)
        if out.shape != (batch, action_dim):
            ok = False
        # bf16-stored weights / bf16 matmul operands vs. pure-f32 reference:
        # tolerance sized for bf16 rounding through three small matmuls.
        if not jnp.allclose(out, ref, atol=5e-2, rtol=5e-2):
            ok = False

    if ok:
        print("KERNEL_OK")
</pallas_src>

<mosaic_0001>
module attributes {stable_mosaic.version = 11 : i64} {
  func.func @_actor_kernel(%arg0: i32, %arg1: memref<1xf32, #tpu.memory_space<smem>>, %arg2: memref<8x17xf32, #tpu.memory_space<vmem>>, %arg3: memref<17x512xbf16, #tpu.memory_space<vmem>>, %arg4: memref<1x512xf32, #tpu.memory_space<vmem>>, %arg5: memref<512x384xbf16, #tpu.memory_space<vmem>>, %arg6: memref<1x384xf32, #tpu.memory_space<vmem>>, %arg7: memref<384x128xbf16, #tpu.memory_space<vmem>>, %arg8: memref<1x128xf32, #tpu.memory_space<vmem>>, %arg9: memref<8x128xf32, #tpu.memory_space<vmem>>) attributes {dimension_semantics = [#tpu.dimension_semantics<parallel>], iteration_bounds = array<i64: 1>, scalar_prefetch = 0 : i64, scratch_operands = 0 : i64, tpu.core_type = #tpu.core_type<tc>, window_params = [{transform_indices = @transform_0, window_bounds = array<i64: 1>}, {transform_indices = @transform_1, window_bounds = array<i64: 8, 17>}, {pipeline_mode = #tpu.pipeline_mode<synchronous>, transform_indices = @transform_2, window_bounds = array<i64: 17, 512>}, {pipeline_mode = #tpu.pipeline_mode<synchronous>, transform_indices = @transform_3, window_bounds = array<i64: 1, 512>}, {pipeline_mode = #tpu.pipeline_mode<synchronous>, transform_indices = @transform_4, window_bounds = array<i64: 512, 384>}, {pipeline_mode = #tpu.pipeline_mode<synchronous>, transform_indices = @transform_5, window_bounds = array<i64: 1, 384>}, {pipeline_mode = #tpu.pipeline_mode<synchronous>, transform_indices = @transform_6, window_bounds = array<i64: 384, 128>}, {pipeline_mode = #tpu.pipeline_mode<synchronous>, transform_indices = @transform_7, window_bounds = array<i64: 1, 128>}, {transform_indices = @transform_8, window_bounds = array<i64: 8, 128>}]} {
    %c0 = arith.constant 0 : index
    %0 = memref.load %arg1[%c0] : memref<1xf32, #tpu.memory_space<smem>>
    %c0_0 = arith.constant 0 : index
    %c0_1 = arith.constant 0 : index
    %1 = vector.load %arg2[%c0_0, %c0_1] : memref<8x17xf32, #tpu.memory_space<vmem>>, vector<8x17xf32>
    %2 = arith.truncf %1 : vector<8x17xf32> to vector<8x17xbf16>
    %c0_2 = arith.constant 0 : index
    %c0_3 = arith.constant 0 : index
    %3 = vector.load %arg3[%c0_2, %c0_3] : memref<17x512xbf16, #tpu.memory_space<vmem>>, vector<17x512xbf16>
    %cst = arith.constant dense<0.000000e+00> : vector<8x512xf32>
    %4 = tpu.matmul %2, %3, %cst {dimension_numbers = #tpu.dot_dimension_numbers<[1], [0], [0], [1], [0, 0, 1, 1], [], []>} : vector<8x17xbf16>, vector<17x512xbf16>, vector<8x512xf32> -> vector<8x512xf32>
    %c0_4 = arith.constant 0 : index
    %c0_5 = arith.constant 0 : index
    %5 = vector.load %arg4[%c0_4, %c0_5] : memref<1x512xf32, #tpu.memory_space<vmem>>, vector<1x512xf32>
    %6 = vector.broadcast %5 : vector<1x512xf32> to vector<8x512xf32>
    %7 = arith.addf %4, %6 : vector<8x512xf32>
    %8 = math.tanh %7 : vector<8x512xf32>
    %9 = arith.truncf %8 : vector<8x512xf32> to vector<8x512xbf16>
    %c0_6 = arith.constant 0 : index
    %c0_7 = arith.constant 0 : index
    %10 = vector.load %arg5[%c0_6, %c0_7] : memref<512x384xbf16, #tpu.memory_space<vmem>>, vector<512x384xbf16>
    %cst_8 = arith.constant dense<0.000000e+00> : vector<8x384xf32>
    %11 = tpu.matmul %9, %10, %cst_8 {dimension_numbers = #tpu.dot_dimension_numbers<[1], [0], [0], [1], [0, 0, 1, 1], [], []>} : vector<8x512xbf16>, vector<512x384xbf16>, vector<8x384xf32> -> vector<8x384xf32>
    %c0_9 = arith.constant 0 : index
    %c0_10 = arith.constant 0 : index
    %12 = vector.load %arg6[%c0_9, %c0_10] : memref<1x384xf32, #tpu.memory_space<vmem>>, vector<1x384xf32>
    %13 = vector.broadcast %12 : vector<1x384xf32> to vector<8x384xf32>
    %14 = arith.addf %11, %13 : vector<8x384xf32>
    %15 = math.tanh %14 : vector<8x384xf32>
    %16 = arith.truncf %15 : vector<8x384xf32> to vector<8x384xbf16>
    %c0_11 = arith.constant 0 : index
    %c0_12 = arith.constant 0 : index
    %17 = vector.load %arg7[%c0_11, %c0_12] : memref<384x128xbf16, #tpu.memory_space<vmem>>, vector<384x128xbf16>
    %cst_13 = arith.constant dense<0.000000e+00> : vector<8x128xf32>
    %18 = tpu.matmul %16, %17, %cst_13 {dimension_numbers = #tpu.dot_dimension_numbers<[1], [0], [0], [1], [0, 0, 1, 1], [], []>} : vector<8x384xbf16>, vector<384x128xbf16>, vector<8x128xf32> -> vector<8x128xf32>
    %c0_14 = arith.constant 0 : index
    %c0_15 = arith.constant 0 : index
    %19 = vector.load %arg8[%c0_14, %c0_15] : memref<1x128xf32, #tpu.memory_space<vmem>>, vector<1x128xf32>
    %20 = vector.broadcast %19 : vector<1x128xf32> to vector<8x128xf32>
    %21 = arith.addf %18, %20 : vector<8x128xf32>
    %22 = math.tanh %21 : vector<8x128xf32>
    %23 = vector.broadcast %0 : f32 to vector<8x128xf32>
    %24 = arith.mulf %23, %22 : vector<8x128xf32>
    %c0_16 = arith.constant 0 : index
    %c0_17 = arith.constant 0 : index
    %25 = vector.load %arg9[%c0_16, %c0_17] : memref<8x128xf32, #tpu.memory_space<vmem>>, vector<8x128xf32>
    tpu.vector_store %arg9[%c0_16, %c0_17], %24 {strides = array<i32>} : memref<8x128xf32, #tpu.memory_space<vmem>>, vector<8x128xf32>,
    return
  }
  func.func @transform_0(%arg0: i32) -> i32 {
    %c0_i32 = arith.constant 0 : i32
    %c0_i32_0 = arith.constant 0 : i32
    return %c0_i32 : i32
  }
  func.func @transform_1(%arg0: i32) -> (i32, i32) {
    %c0_i32 = arith.constant 0 : i32
    %c0_i32_0 = arith.constant 0 : i32
    return %arg0, %c0_i32 : i32, i32
  }
  func.func @transform_2(%arg0: i32) -> (i32, i32) {
    %c0_i32 = arith.constant 0 : i32
    %c0_i32_0 = arith.constant 0 : i32
    %c0_i32_1 = arith.constant 0 : i32
    return %c0_i32, %c0_i32_0 : i32, i32
  }
  func.func @transform_3(%arg0: i32) -> (i32, i32) {
    %c0_i32 = arith.constant 0 : i32
    %c0_i32_0 = arith.constant 0 : i32
    %c0_i32_1 = arith.constant 0 : i32
    return %c0_i32, %c0_i32_0 : i32, i32
  }
  func.func @transform_4(%arg0: i32) -> (i32, i32) {
    %c0_i32 = arith.constant 0 : i32
    %c0_i32_0 = arith.constant 0 : i32
    %c0_i32_1 = arith.constant 0 : i32
    return %c0_i32, %c0_i32_0 : i32, i32
  }
  func.func @transform_5(%arg0: i32) -> (i32, i32) {
    %c0_i32 = arith.constant 0 : i32
    %c0_i32_0 = arith.constant 0 : i32
    %c0_i32_1 = arith.constant 0 : i32
    return %c0_i32, %c0_i32_0 : i32, i32
  }
  func.func @transform_6(%arg0: i32) -> (i32, i32) {
    %c0_i32 = arith.constant 0 : i32
    %c0_i32_0 = arith.constant 0 : i32
    %c0_i32_1 = arith.constant 0 : i32
    return %c0_i32, %c0_i32_0 : i32, i32
  }
  func.func @transform_7(%arg0: i32) -> (i32, i32) {
    %c0_i32 = arith.constant 0 : i32
    %c0_i32_0 = arith.constant 0 : i32
    %c0_i32_1 = arith.constant 0 : i32
    return %c0_i32, %c0_i32_0 : i32, i32
  }
  func.func @transform_8(%arg0: i32) -> (i32, i32) {
    %c0_i32 = arith.constant 0 : i32
    %c0_i32_0 = arith.constant 0 : i32
    return %arg0, %c0_i32 : i32, i32
  }
}

</mosaic_0001>

<bundles_post_ra>
// kernel: tpu_custom_call.1
= control target key start
LH: loop header
LB: loop body
LE: loop exit
PB: predicated region body
PF: predicated region fallthrough
CT: control target
= control target key end

     0   :  { %14 = vsyncpa [#allocation4], 0  ;;  %s2071_s0 = inlined_call_operand.<no memory space> [shape: f32[1], index: 0, kind: input, shape index: {}]   ;;  %s2072_s1 = inlined_call_operand.hbm [shape: f32[8,17], index: 1, kind: input, shape index: {}]   ;;  %s2073_s2 = inlined_call_operand.hbm [shape: bf16[17,512], index: 2, kind: input, shape index: {}]   ;;  %s2074_s3 = inlined_call_operand.vmem [shape: f32[1,512], index: 3, kind: input, shape index: {}]   ;;  %s2075_s4 = inlined_call_operand.hbm [shape: bf16[512,384], index: 4, kind: input, shape index: {}]   ;;  %s2076_s5 = inlined_call_operand.vmem [shape: f32[1,384], index: 5, kind: input, shape index: {}]   ;;  %s2077_s6 = inlined_call_operand.hbm [shape: bf16[384,128], index: 6, kind: input, shape index: {}]   ;;  %s2078_s7 = inlined_call_operand.vmem [shape: f32[1,128], index: 7, kind: input, shape index: {}]   ;;  %s2079_s8 = inlined_call_operand.hbm [shape: f32[8,128], index: 8, kind: output, shape index: {}]  }
   0x1   :  { %15 = vsyncpa [#allocation7], 0 }
   0x2   :  { %16 = vsyncpa [#allocation10], 0 }
   0x3   :  { %17 = vsyncpa [#allocation5], 0  ;;  %s1922_s27 = smov [#allocation6]   ;;  %s1804_s9 = scalar_lea.hbm %s2073_s2, 768 }
   0x4   :  { %s35_s28 = sshll.u32 %s1922_s27, 4  ;;  %p1805_p0 = scmp.ne.s32.totalorder %s2073_s2, %s1804_s9  ;;  %s36_s28 = int_to_ptr.vmem [resolvable:$true] %s35_s28 }
   0x5   :  { %p1808_p1 = scmp.lt.u32.totalorder %s1804_s9, %s2073_s2 }
   0x7   :  { %p1810_p2 = pnand %p1808_p1, %p1805_p0 }
   0x9   :  { %1813 = shalt.err (!%p1810_p2)
}
   0xa   :  { %s1814_s14 = scalar_lea.vmem %s36_s28, 768  ;;  %p1819_p4 = scmp.lt.s32.totalorder %s36_s28, %s36_s28 }
   0xb   :  { %p1815_p3 = scmp.ne.s32.totalorder %s36_s28, %s1814_s14  ;;  %p1820_p5 = scmp.lt.s32.totalorder %s1814_s14, %s1814_s14 }
   0xd   :  { %p1821_p6 = por %p1820_p5, %p1819_p4 }
   0xf   :  { %p1822_p7 = pnand %p1821_p6, %p1815_p3 }
  0x11   :  { %1825 = shalt.err (!%p1822_p7)
}
  0x12   :  { %s1923_s15 = smov 256   ;;  %s1924_s16 = smov 16  }
  0x13   :  { %41 = dma.hbm_to_vmem [thread:$0]  %s2073_s2, 768, %s36_s28, [#allocation7], %s1923_s15, %s1923_s15, %s1924_s16  }
  0x14   :  { %s1925_s19 = smov [#allocation3]   ;;  %s1926_s21 = smov [#allocation8]  }
  0x15   :  { %s26_s20 = sshll.u32 %s1925_s19, 4  ;;  %s49_s22 = sshll.u32 %s1926_s21, 4  ;;  %s27_s20 = int_to_ptr.vmem [resolvable:$true] %s26_s20  ;;  %s50_s22 = int_to_ptr.vmem [resolvable:$true] %s49_s22 }
  0x16   :  { %s1826_s25 = scalar_lea.hbm %s2072_s1, 128 }
  0x17   :  { %p1827_p8 = scmp.ne.s32.totalorder %s2072_s1, %s1826_s25  ;;  %p1830_p9 = scmp.lt.u32.totalorder %s1826_s25, %s2072_s1 }
  0x19   :  { %p1832_p10 = pnand %p1830_p9, %p1827_p8 }
  0x1b   :  { %1835 = shalt.err (!%p1832_p10)
}
  0x1c   :  { %s1836_s2 = scalar_lea.vmem %s27_s20, 128  ;;  %p1841_p12 = scmp.lt.s32.totalorder %s27_s20, %s27_s20 }
  0x1d   :  { %p1837_p11 = scmp.ne.s32.totalorder %s27_s20, %s1836_s2  ;;  %p1842_p13 = scmp.lt.s32.totalorder %s1836_s2, %s1836_s2 }
  0x1f   :  { %p1843_p0 = por %p1842_p13, %p1841_p12 }
  0x21   :  { %p1844_p1 = pnand %p1843_p0, %p1837_p11 }
  0x23   :  { %1847 = shalt.err (!%p1844_p1)
}
  0x24   :  { %29 = dma.hbm_to_vmem [thread:$0]  %s2072_s1, 128, %s27_s20, [#allocation4]  }
  0x25   :  { %s1848_s12 = scalar_lea.hbm %s2075_s4, 12288 }
  0x26   :  { %p1849_p2 = scmp.ne.s32.totalorder %s2075_s4, %s1848_s12  ;;  %p1852_p3 = scmp.lt.u32.totalorder %s1848_s12, %s2075_s4 }
  0x28   :  { %p1854_p4 = pnand %p1852_p3, %p1849_p2 }
  0x2a   :  { %1857 = shalt.err (!%p1854_p4)
}
  0x2b   :  { %s1858_s17 = scalar_lea.vmem %s50_s22, 12288  ;;  %p1863_p6 = scmp.lt.s32.totalorder %s50_s22, %s50_s22 }
  0x2c   :  { %p1859_p5 = scmp.ne.s32.totalorder %s50_s22, %s1858_s17  ;;  %p1864_p7 = scmp.lt.s32.totalorder %s1858_s17, %s1858_s17 }
  0x2e   :  { %p1865_p8 = por %p1864_p7, %p1863_p6 }
  0x30   :  { %p1866_p9 = pnand %p1865_p8, %p1859_p5 }
  0x32   :  { %1869 = shalt.err (!%p1866_p9)
}
  0x33   :  { %s1927_s1 = smov 192   ;;  %s1928_s18 = smov 12  }
  0x34   :  { %55 = dma.hbm_to_vmem [thread:$0]  %s2075_s4, 12288, %s50_s22, [#allocation7], %s1927_s1, %s1927_s1, %s1928_s18  }
  0x35   :  { %s1929_s21 = smov [#allocation9]   ;;  %s1870_s26 = scalar_lea.hbm %s2077_s6, 3072 }
  0x36   :  { %s63_s23 = sshll.u32 %s1929_s21, 4  ;;  %p1871_p10 = scmp.ne.s32.totalorder %s2077_s6, %s1870_s26  ;;  %s64_s23 = int_to_ptr.vmem [resolvable:$true] %s63_s23 }
  0x37   :  { %p1874_p11 = scmp.lt.u32.totalorder %s1870_s26, %s2077_s6 }
  0x39   :  { %p1876_p12 = pnand %p1874_p11, %p1871_p10 }
  0x3b   :  { %1879 = shalt.err (!%p1876_p12)
}
  0x3c   :  { %s1880_s28 = scalar_lea.vmem %s64_s23, 3072  ;;  %p1885_p0 = scmp.lt.s32.totalorder %s64_s23, %s64_s23 }
  0x3d   :  { %p1881_p13 = scmp.ne.s32.totalorder %s64_s23, %s1880_s28  ;;  %p1886_p1 = scmp.lt.s32.totalorder %s1880_s28, %s1880_s28 }
  0x3f   :  { %p1887_p2 = por %p1886_p1, %p1885_p0 }
  0x41   :  { %p1888_p3 = pnand %p1887_p2, %p1881_p13 }
  0x43   :  { %1891 = shalt.err (!%p1888_p3)
}
  0x44   :  { %s1930_s4 = smov 64   ;;  %s1931_s22 = smov 4  }
  0x45   :  { %69 = dma.hbm_to_vmem [thread:$0]  %s2077_s6, 3072, %s64_s23, [#allocation10], %s1930_s4, %s1930_s4, %s1931_s22  }
  0x46   :  { %1914 = dma.done.wait [#allocation4], 128  }
  0x47   :  { %1915 = vsyncadd [#allocation4], 4294967168 }
  0x48   :  { %1916 = dma.done.wait [#allocation7], 13056  }
  0x49   :  { %1917 = vsyncadd [#allocation7], 4294954240 }
  0x4a   :  { %1918 = dma.done.wait [#allocation10], 3072  }
  0x4b   :  { %1919 = vsyncadd [#allocation10], 4294964224  ;;  %v1932_v0 = vmov 0   ;;  %vm150_vm0 = vcmask 1040384   ;;  %v1626_v1 = vld [vmem:[#allocation6 + $0x4] ss:$16 sps:$4 sm:$0xff]  }
  0x4c   :  { %197 = vmatprep.mubr.bf16.mxu0 %v1932_v0  ;;  %238 = vmatprep.mubr.bf16.mxu1 %v1932_v0  ;;  %v1628_v2 = vld [vmem:[#allocation6] ss:$16 sps:$4 sm:$0xff]   ;;  %v152_v4 = vsel %vm150_vm0, 65535, %v1932_v0  ;;  %v86_v5 = vld [vmem:[#allocation3] sm:$0xff]  ;;  %v93_v10 = vld [vmem:[#allocation6 + $0x28] sm:$0x11] }
  0x4d   :  { %v92_v3 = vld [vmem:[#allocation6 + $0x20] sm:$0x11]  ;;  %165 = vmatprep.subr.bf16.mxu0 %v1626_v1  ;;  %v1631_v8 = vld [vmem:[#allocation6 + $0xc] ss:$16 sps:$4 sm:$0xff]   ;;  %v1633_v9 = vld [vmem:[#allocation6 + $0x8] ss:$16 sps:$4 sm:$0xff]   ;;  %v1387_v13 = vcombine.high %v93_v10, %v93_v10  ;;  %v1386_v14 = vcombine.low %v93_v10, %v93_v10  ;;  %v87_v16 = vpack.c.bf16 %v86_v5, %v86_v5 }
  0x4e   :  { %v1385_v6 = vcombine.high %v92_v3, %v92_v3  ;;  %v1384_v7 = vcombine.low %v92_v3, %v92_v3  ;;  %166 = vmatpush1.bf16.msra.mxu0 %v1628_v2  ;;  %206 = vmatprep.subr.bf16.mxu1 %v1631_v8  ;;  %v1638_v15 = vld [vmem:[#allocation8 + $0x4] ss:$12 sps:$4 sm:$0xff]   ;;  %vm146_vm1 = vcmask 138240   ;;  %v1636_v19 = vld [vmem:[#allocation8] ss:$12 sps:$4 sm:$0xff]   ;;  %vm1934_vm2 = vmmov 0  }
  0x4f   :  { %207 = vmatpush1.bf16.msra.mxu1 %v1633_v9  ;;  %v163_v17 = vand.u32 %v1387_v13, %v152_v4  ;;  %v160_v18 = vand.u32 %v1386_v14, %v152_v4  ;;  %v1641_v20 = vld [vmem:[#allocation8 + $0x1c] ss:$12 sps:$4 sm:$0xff]   ;;  %v1639_v21 = vld [vmem:[#allocation8 + $0x18] ss:$12 sps:$4 sm:$0xff]   ;;  %v1644_v22 = vld [vmem:[#allocation8 + $0x34] ss:$12 sps:$4 sm:$0xff]  }
  0x50   :  { %v157_v11 = vand.u32 %v1385_v6, %v152_v4  ;;  %v154_v12 = vand.u32 %v1384_v7, %v152_v4  ;;  %v1642_v23 = vld [vmem:[#allocation8 + $0x30] ss:$12 sps:$4 sm:$0xff]   ;;  %v1647_v24 = vld [vmem:[#allocation8 + $0x4c] ss:$12 sps:$4 sm:$0xff]   ;;  %v1663_v25 = vld [vmem:[#allocation8 + $0xc8] ss:$12 sps:$4 sm:$0xff]   ;;  %v96_v4 = vlaneseq }
  0x51   :  { %208 = vmatprep.subr.bf16.mxu1 %v163_v17  ;;  %v1664_v26 = vld [vmem:[#allocation8 + $0x8] ss:$12 sps:$4 sm:$0xff]   ;;  %v1650_v28 = vld [vmem:[#allocation8 + $0x64] ss:$12 sps:$4 sm:$0xff]   ;;  %v1668_v29 = vld [vmem:[#allocation8 + $0xe0] ss:$12 sps:$4 sm:$0xff]  }
  0x52   :  { %167 = vmatprep.subr.bf16.mxu0 %v157_v11  ;;  %v1645_v27 = vld [vmem:[#allocation8 + $0x48] ss:$12 sps:$4 sm:$0xff]   ;;  %v1669_v30 = vld [vmem:[#allocation8 + $0x20] ss:$12 sps:$4 sm:$0xff]   ;;  %v1673_v33 = vld [vmem:[#allocation8 + $0xf8] ss:$12 sps:$4 sm:$0xff]  }
  0x53   :  { %168 = vmatpush1.bf16.msra.mxu0 %v154_v12  ;;  %209 = vmatpush1.bf16.msra.mxu1 %v160_v18  ;;  %v1648_v31 = vld [vmem:[#allocation8 + $0x60] ss:$12 sps:$4 sm:$0xff]   ;;  %v1653_v32 = vld [vmem:[#allocation8 + $0x7c] ss:$12 sps:$4 sm:$0xff]   ;;  %v1674_v34 = vld [vmem:[#allocation8 + $0x38] ss:$12 sps:$4 sm:$0xff]  }
  0x54   :  { %912 = vmatprep.subr.bf16.mxu0 %v1638_v15  ;;  %1511 = vmatprep.subr.bf16.mxu1 %v1663_v25  ;;  %v1651_v35 = vld [vmem:[#allocation8 + $0x78] ss:$12 sps:$4 sm:$0xff]   ;;  %v1678_v36 = vld [vmem:[#allocation8 + $0x110] ss:$12 sps:$4 sm:$0xff]   ;;  %v1656_v37 = vld [vmem:[#allocation8 + $0x94] ss:$12 sps:$4 sm:$0xff]  }
  0x55   :  { %v1679_v38 = vld [vmem:[#allocation8 + $0x50] ss:$12 sps:$4 sm:$0xff]   ;;  %v1659_v40 = vld [vmem:[#allocation8 + $0xac] ss:$12 sps:$4 sm:$0xff]   ;;  %v1657_v41 = vld [vmem:[#allocation8 + $0xa8] ss:$12 sps:$4 sm:$0xff]  }
  0x56   :  { %1388 = vmatmul.mubr.msk.bf16.vlgmr.msra.gmra.mrb[0].mxu0 %vm146_vm1, %v87_v16  ;;  %1389 = vmatmul.mubr.msk.bf16.vlgmr.msra.gmra.mrb[0].mxu1 %vm146_vm1, %v87_v16  ;;  %v1654_v39 = vld [vmem:[#allocation8 + $0x90] ss:$12 sps:$4 sm:$0xff]   ;;  %v1660_v43 = vld [vmem:[#allocation8 + $0xc0] ss:$12 sps:$4 sm:$0xff]   ;;  %v1665_v45 = vld [vmem:[#allocation8 + $0xd8] ss:$12 sps:$4 sm:$0xff]  }
  0x57   :  { %913 = vmatpush1.bf16.msra.mxu0 %v1636_v19  ;;  %1512 = vmatpush3.bf16.msra.mxu1 %v1664_v26  ;;  %v1662_v42 = vld [vmem:[#allocation8 + $0xc4] ss:$12 sps:$4 sm:$0xff]   ;;  %v1667_v44 = vld [vmem:[#allocation8 + $0xdc] ss:$12 sps:$4 sm:$0xff]   ;;  %v1672_v46 = vld [vmem:[#allocation8 + $0xf4] ss:$12 sps:$4 sm:$0xff]  }
  0x58   :  { %914 = vmatprep.subr.bf16.mxu0 %v1641_v20  ;;  %1513 = vmatprep.subr.bf16.mxu1 %v1668_v29  ;;  %v1670_v47 = vld [vmem:[#allocation8 + $0xf0] ss:$12 sps:$4 sm:$0xff]   ;;  %v1677_v48 = vld [vmem:[#allocation8 + $0x10c] ss:$12 sps:$4 sm:$0xff]   ;;  %v1675_v49 = vld [vmem:[#allocation8 + $0x108] ss:$12 sps:$4 sm:$0xff]  }
  0x59   :  { %v1682_v50 = vld [vmem:[#allocation8 + $0x124] ss:$12 sps:$4 sm:$0xff]   ;;  %v1683_v51 = vld [vmem:[#allocation8 + $0x128] ss:$12 sps:$4 sm:$0xff]   ;;  %v1680_v52 = vld [vmem:[#allocation8 + $0x120] ss:$12 sps:$4 sm:$0xff]  }
  0x5a   :  { %v1684_v53 = vld [vmem:[#allocation8 + $0x68] ss:$12 sps:$4 sm:$0xff]   ;;  %v1688_v55 = vld [vmem:[#allocation8 + $0x140] ss:$12 sps:$4 sm:$0xff]   ;;  %v1685_v56 = vld [vmem:[#allocation8 + $0x138] ss:$12 sps:$4 sm:$0xff]  }
  0x5b   :  { %915 = vmatpush1.bf16.msra.mxu0 %v1639_v21  ;;  %1514 = vmatpush3.bf16.msra.mxu1 %v1669_v30  ;;  %v1687_v54 = vld [vmem:[#allocation8 + $0x13c] ss:$12 sps:$4 sm:$0xff]   ;;  %v1689_v57 = vld [vmem:[#allocation8 + $0x80] ss:$12 sps:$4 sm:$0xff]   ;;  %v1693_v59 = vld [vmem:[#allocation8 + $0x158] ss:$12 sps:$4 sm:$0xff]  }
  0x5c   :  { %916 = vmatprep.subr.bf16.mxu0 %v1644_v22  ;;  %1515 = vmatprep.subr.bf16.mxu1 %v1673_v33  ;;  %v1692_v58 = vld [vmem:[#allocation8 + $0x154] ss:$12 sps:$4 sm:$0xff]   ;;  %v1690_v60 = vld [vmem:[#allocation8 + $0x150] ss:$12 sps:$4 sm:$0xff]   ;;  %v1694_v61 = vld [vmem:[#allocation8 + $0x98] ss:$12 sps:$4 sm:$0xff]  }
  0x5d   :  { %v1697_v62 = vld [vmem:[#allocation8 + $0x16c] ss:$12 sps:$4 sm:$0xff]   ;;  %v1698_v63 = vld [vmem:[#allocation8 + $0x170] ss:$12 sps:$4 sm:$0xff]   ;;  %v1695_v0 = vld [vmem:[#allocation8 + $0x168] ss:$12 sps:$4 sm:$0xff]  }
  0x5e   :  { %v1699_v1 = vld [vmem:[#allocation8 + $0xb0] ss:$12 sps:$4 sm:$0xff]   ;;  %v1703_v3 = vld [vmem:[#allocation8 + $0x248] ss:$12 sps:$4 sm:$0xff]   ;;  %v2029_v5 = vshrl.u32 %v96_v4, 7  ;;  %s1935_s16 = smov [#allocation11]  }
  0x5f   :  { %917 = vmatpush1.bf16.msra.mxu0 %v1642_v23  ;;  %1516 = vmatpush3.bf16.msra.mxu1 %v1674_v34  ;;  %v1702_v2 = vld [vmem:[#allocation8 + $0x184] ss:$12 sps:$4 sm:$0xff]   ;;  %v94_v7 = vld [vmem:[%s2074_s3] sm:$0xf]  ;;  %s1369_s17 = sshll.u32 %s1935_s16, 4  ;;  %s1370_s17 = int_to_ptr.vmem [resolvable:$true] %s1369_s17 }
  0x60   :  { %918 = vmatprep.subr.bf16.mxu0 %v1647_v24  ;;  %1517 = vmatprep.subr.bf16.mxu1 %v1678_v36  ;;  %v98_v6 = vsub.s32 0, %v2029_v5  ;;  %v102_v8 = vsub.s32 1, %v2029_v5  ;;  %v110_v9 = vsub.s32 3, %v2029_v5  ;;  %v1705_v34 = vld [vmem:[#allocation8 + $0x198] ss:$12 sps:$4 sm:$0xff]   ;;  %s1892_s1 = scalar_lea.vmem %s1370_s17, 128  ;;  %p1897_p5 = scmp.lt.s32.totalorder %s1370_s17, %s1370_s17 }
  0x61   :  { %v1712_v36 = vld [vmem:[#allocation8 + $0x1b4] ss:$12 sps:$4 sm:$0xff]   ;;  %v1743_v4 = vld [vmem:[#allocation8 + $0x258] ss:$12 sps:$4 sm:$0xff]   ;;  %p1893_p4 = scmp.ne.s32.totalorder %s1370_s17, %s1892_s1  ;;  %p1898_p6 = scmp.lt.s32.totalorder %s1892_s1, %s1892_s1 }
  0x62   :  { %v99_v10 = vrot.slane %v94_v7, %v98_v6  ;;  %v103_v11 = vrot.slane %v94_v7, %v102_v8  ;;  %v111_v13 = vrot.slane %v94_v7, %v110_v9  ;;  %v1746_v9 = vld [vmem:[#allocation8 + $0x270] ss:$12 sps:$4 sm:$0xff]  }
  0x63   :  { %919 = vmatpush1.bf16.msra.mxu0 %v1645_v27  ;;  %1518 = vmatpush3.bf16.msra.mxu1 %v1679_v38  ;;  %v1700_v27 = vld [vmem:[#allocation8 + $0x180] ss:$12 sps:$4 sm:$0xff]   ;;  %v106_v38 = vsub.s32 2, %v2029_v5  ;;  %v1782_v5 = vld [vmem:[#allocation9 + $0x90] sm:$0xff]   ;;  %p1899_p7 = por %p1898_p6, %p1897_p5 }
  0x64   :  { %920 = vmatprep.subr.bf16.mxu0 %v1650_v28  ;;  %1519 = vmatprep.subr.bf16.mxu1 %v1683_v51  ;;  %v1704_v28 = vld [vmem:[#allocation8 + $0x188] ss:$12 sps:$4 sm:$0xff]  }
  0x65   :  { %v1727_v51 = vld [vmem:[#allocation8 + $0x1fc] ss:$12 sps:$4 sm:$0xff]   ;;  %p1900_p8 = pnand %p1899_p7, %p1893_p4 }
  0x67   :  { %921 = vmatpush1.bf16.msra.mxu0 %v1648_v31  ;;  %1520 = vmatpush3.bf16.msra.mxu1 %v1684_v53  ;;  %v1707_v31 = vld [vmem:[#allocation8 + $0x19c] ss:$12 sps:$4 sm:$0xff]   ;;  %v1725_v53 = vld [vmem:[#allocation8 + $0x1f8] ss:$12 sps:$4 sm:$0xff]  }
  0x68   :  { %922 = vmatprep.subr.bf16.mxu0 %v1653_v32  ;;  %1521 = vmatprep.subr.bf16.mxu1 %v1688_v55  ;;  %v1708_v32 = vld [vmem:[#allocation8 + $0x260] ss:$12 sps:$4 sm:$0xff]  }
  0x69   :  { %v1732_v55 = vld [vmem:[#allocation8 + $0x214] ss:$12 sps:$4 sm:$0xff]  }
  0x6b   :  { %923 = vmatpush1.bf16.msra.mxu0 %v1651_v35  ;;  %1522 = vmatpush3.bf16.msra.mxu1 %v1689_v57  ;;  %v1709_v35 = vld [vmem:[#allocation8 + $0x1a0] ss:$12 sps:$4 sm:$0xff]   ;;  %v1730_v57 = vld [vmem:[#allocation8 + $0x210] ss:$12 sps:$4 sm:$0xff]  }
  0x6c   :  { %924 = vmatprep.subr.bf16.mxu0 %v1656_v37  ;;  %1523 = vmatprep.subr.bf16.mxu1 %v1693_v59  ;;  %v1713_v37 = vld [vmem:[#allocation8 + $0x278] ss:$12 sps:$4 sm:$0xff]  }
  0x6d   :  { %v1737_v59 = vld [vmem:[#allocation8 + $0x22c] ss:$12 sps:$4 sm:$0xff]  }
  0x6f   :  { %925 = vmatpush1.bf16.msra.mxu0 %v1654_v39  ;;  %1524 = vmatpush3.bf16.msra.mxu1 %v1694_v61  ;;  %v1710_v39 = vld [vmem:[#allocation8 + $0x1b0] ss:$12 sps:$4 sm:$0xff]  }
  0x70   :  { %926 = vmatprep.subr.bf16.mxu0 %v1659_v40  ;;  %1525 = vmatprep.subr.bf16.mxu1 %v1698_v63  ;;  %v1714_v40 = vld [vmem:[#allocation8 + $0x1b8] ss:$12 sps:$4 sm:$0xff]   ;;  %v1739_v63 = vld [vmem:[#allocation8 + $0x230] ss:$12 sps:$4 sm:$0xff]  }
  0x73   :  { %927 = vmatpush1.bf16.msra.mxu0 %v1657_v41  ;;  %1526 = vmatpush3.bf16.msra.mxu1 %v1699_v1  ;;  %v1717_v41 = vld [vmem:[#allocation8 + $0x1cc] ss:$12 sps:$4 sm:$0xff]  }
  0x74   :  { %928 = vmatprep.subr.bf16.mxu0 %v1662_v42  ;;  %1533 = vmatprep.subr.bf16.mxu1 %v1703_v3  ;;  %v1718_v42 = vld [vmem:[#allocation8 + $0x290] ss:$12 sps:$4 sm:$0xff]  }
  0x75   :  { %v1745_v3 = vld [vmem:[#allocation8 + $0x25c] ss:$12 sps:$4 sm:$0xff]  }
  0x77   :  { %929 = vmatpush1.bf16.msra.mxu0 %v1660_v43  ;;  %v107_v43 = vrot.slane %v94_v7, %v106_v38  ;;  %v1748_v7 = vld [vmem:[#allocation8 + $0x274] ss:$12 sps:$4 sm:$0xff]  }
  0x78   :  { %930 = vmatprep.subr.bf16.mxu0 %v1667_v44  ;;  %v1715_v44 = vld [vmem:[#allocation8 + $0x1c8] ss:$12 sps:$4 sm:$0xff]  }
  0x7b   :  { %931 = vmatpush1.bf16.msra.mxu0 %v1665_v45  ;;  %v1719_v45 = vld [vmem:[#allocation8 + $0x1d0] ss:$12 sps:$4 sm:$0xff]  }
  0x7c   :  { %932 = vmatprep.subr.bf16.mxu0 %v1672_v46  ;;  %v1722_v46 = vld [vmem:[#allocation8 + $0x1e4] ss:$12 sps:$4 sm:$0xff]  }
  0x7f   :  { %933 = vmatpush1.bf16.msra.mxu0 %v1670_v47  ;;  %v1723_v47 = vld [vmem:[#allocation8 + $0x2a8] ss:$12 sps:$4 sm:$0xff]  }
  0x80   :  { %934 = vmatprep.subr.bf16.mxu0 %v1677_v48 }
  0x83   :  { %935 = vmatpush1.bf16.msra.mxu0 %v1675_v49  ;;  %v1720_v49 = vld [vmem:[#allocation8 + $0x1e0] ss:$12 sps:$4 sm:$0xff]  }
  0x84   :  { %936 = vmatprep.subr.bf16.mxu0 %v1682_v50  ;;  %v1724_v50 = vld [vmem:[#allocation8 + $0x1e8] ss:$12 sps:$4 sm:$0xff]  }
  0x87   :  { %937 = vmatpush1.bf16.msra.mxu0 %v1680_v52  ;;  %v1728_v52 = vld [vmem:[#allocation8 + $0x2c0] ss:$12 sps:$4 sm:$0xff]  }
  0x88   :  { %938 = vmatprep.subr.bf16.mxu0 %v1687_v54  ;;  %v1729_v54 = vld [vmem:[#allocation8 + $0x200] ss:$12 sps:$4 sm:$0xff]  }
  0x8b   :  { %939 = vmatpush1.bf16.msra.mxu0 %v1685_v56  ;;  %v1733_v56 = vld [vmem:[#allocation8 + $0x2d8] ss:$12 sps:$4 sm:$0xff]  }
  0x8c   :  { %940 = vmatprep.subr.bf16.mxu0 %v1692_v58  ;;  %v1734_v58 = vld [vmem:[#allocation8 + $0x218] ss:$12 sps:$4 sm:$0xff]  }
  0x8f   :  { %941 = vmatpush1.bf16.msra.mxu0 %v1690_v60  ;;  %v1738_v60 = vld [vmem:[#allocation8 + $0x2f0] ss:$12 sps:$4 sm:$0xff]  }
  0x90   :  { %942 = vmatprep.subr.bf16.mxu0 %v1697_v62  ;;  %v1735_v62 = vld [vmem:[#allocation8 + $0x228] ss:$12 sps:$4 sm:$0xff]  }
  0x93   :  { %943 = vmatpush1.bf16.msra.mxu0 %v1695_v0  ;;  %v1742_v0 = vld [vmem:[#allocation8 + $0x244] ss:$12 sps:$4 sm:$0xff]  }
  0x94   :  { %953 = vmatprep.subr.bf16.mxu0 %v1702_v2  ;;  %v1740_v2 = vld [vmem:[#allocation8 + $0x240] ss:$12 sps:$4 sm:$0xff]  }
 0x129   :  { %v199_v12 = vpop.f32.mrb[0].mxu0  ;;  %v240_v18 = vpop.f32.mrb[0].mxu1 }
 0x12a   :  { %v200_v14 = vadd.f32 %v199_v12, %v99_v10  ;;  %v201_v15 = vpop.f32.mrb[1].mxu0  ;;  %v242_v20 = vpop.f32.mrb[1].mxu1  ;;  %v241_v48 = vadd.f32 %v240_v18, %v107_v43  ;;  %v1751_v10 = vld [vmem:[#allocation8 + $0x28c] ss:$12 sps:$4 sm:$0xff]   ;;  %v1754_v12 = vld [vmem:[#allocation8 + $0x2a4] ss:$12 sps:$4 sm:$0xff]  }
 0x12b   :  { %v202_v16 = vadd.f32 %v201_v15, %v103_v11  ;;  %v203_v17 = vpop.f32.mrb[2].mxu0  ;;  %v243_v21 = vadd.f32 %v242_v20, %v111_v13  ;;  %v244_v22 = vpop.f32.mrb[2].mxu1  ;;  %v1749_v11 = vld [vmem:[#allocation8 + $0x288] ss:$12 sps:$4 sm:$0xff]   ;;  %v1752_v13 = vld [vmem:[#allocation8 + $0x2a0] ss:$12 sps:$4 sm:$0xff]  }
 0x12c   :  { %1788 = vtanh.f32 %v200_v14  ;;  %v204_v19 = vpop.f32.mrb[3].mxu0  ;;  %v245_v23 = vpop.f32.mrb[3].mxu1  ;;  %v1757_v14 = vld [vmem:[#allocation8 + $0x2bc] ss:$12 sps:$4 sm:$0xff]   ;;  %v1755_v15 = vld [vmem:[#allocation8 + $0x2b8] ss:$12 sps:$4 sm:$0xff]  }
 0x12d   :  { %1790 = vtanh.f32 %v202_v16  ;;  %v1760_v16 = vld [vmem:[#allocation8 + $0x2d4] ss:$12 sps:$4 sm:$0xff]   ;;  %v1758_v17 = vld [vmem:[#allocation8 + $0x2d0] ss:$12 sps:$4 sm:$0xff]   ;;  %v1763_v18 = vld [vmem:[#allocation8 + $0x2ec] ss:$12 sps:$4 sm:$0xff]  }
 0x12e   :  { %1792 = vtanh.f32 %v243_v21  ;;  %v1761_v19 = vld [vmem:[#allocation8 + $0x2e8] ss:$12 sps:$4 sm:$0xff]   ;;  %v1764_v20 = vld [vmem:[#allocation9 + $0x40] sm:$0xff]  }
 0x12f   :  { %1794 = vtanh.f32 %v241_v48  ;;  %v1765_v21 = vld [vmem:[#allocation9] sm:$0xff]   ;;  %v1766_v22 = vld [vmem:[#allocation9 + $0x48] sm:$0xff]  }
 0x130   :  { %v1767_v23 = vld [vmem:[#allocation9 + $0x8] sm:$0xff]  }
 0x131   :  { %v383_v43 = vld [vmem:[%s2076_s5] sm:$0x7] }
 0x136   :  { %v1789_v24 = vpop.eup %1788 }
 0x137   :  { %v1791_v25 = vpop.eup %1790  ;;  %v251_v30 = vpack.c.bf16 %v1789_v24, %v1789_v24  ;;  %v1768_v24 = vld [vmem:[#allocation9 + $0x50] sm:$0xff]  }
 0x138   :  { %v252_v26 = vpack.c.bf16 %v1791_v25, %v1791_v25  ;;  %v1793_v29 = vpop.eup %1792  ;;  %v1769_v25 = vld [vmem:[#allocation9 + $0x10] sm:$0xff]  }
 0x139   :  { %v254_v33 = vpack.c.bf16 %v1793_v29, %v1793_v29  ;;  %v1795_v61 = vpop.eup %1794  ;;  %v1773_v29 = vld [vmem:[#allocation9 + $0x20] sm:$0xff]  }
 0x13a   :  { %944 = vmatprep.mubr.bf16.mxu0 %v252_v26  ;;  %1026 = vmatprep.mubr.bf16.mxu1 %v252_v26  ;;  %v253_v1 = vpack.c.bf16 %v1795_v61, %v1795_v61  ;;  %v1770_v26 = vld [vmem:[#allocation9 + $0x58] sm:$0xff]  }
 0x13b   :  { %945 = vmatmul.mubr.bf16.vlgmr.msra.gmra.mrb[4].mxu0 %v251_v30  ;;  %1027 = vmatmul.mubr.bf16.vlgmr.msra.gmra.mrb[4].mxu1 %v251_v30  ;;  %v1774_v30 = vld [vmem:[#allocation9 + $0x68] sm:$0xff]  }
 0x13c   :  { %954 = vmatpush1.bf16.msra.mxu0 %v1700_v27  ;;  %1534 = vmatpush3.bf16.msra.mxu1 %v1704_v28  ;;  %v1771_v27 = vld [vmem:[#allocation9 + $0x18] sm:$0xff]   ;;  %v1772_v28 = vld [vmem:[#allocation9 + $0x60] sm:$0xff]  }
 0x13d   :  { %955 = vmatprep.subr.bf16.mxu0 %v1707_v31  ;;  %1535 = vmatprep.subr.bf16.mxu1 %v1708_v32  ;;  %v1775_v31 = vld [vmem:[#allocation9 + $0x28] sm:$0xff]   ;;  %v1776_v32 = vld [vmem:[#allocation9 + $0x70] sm:$0xff]  }
 0x13e   :  { %1066 = vmatprep.mubr.bf16.mxu1 %v254_v33  ;;  %985 = vmatprep.mubr.bf16.mxu0 %v254_v33  ;;  %v1777_v33 = vld [vmem:[#allocation9 + $0x30] sm:$0xff]  }
 0x140   :  { %956 = vmatpush1.bf16.msra.mxu0 %v1705_v34  ;;  %1536 = vmatpush3.bf16.msra.mxu1 %v1709_v35  ;;  %v1778_v34 = vld [vmem:[#allocation9 + $0x78] sm:$0xff]  }
 0x141   :  { %957 = vmatprep.subr.bf16.mxu0 %v1712_v36  ;;  %1537 = vmatprep.subr.bf16.mxu1 %v1713_v37  ;;  %v1779_v35 = vld [vmem:[#allocation9 + $0x38] sm:$0xff]   ;;  %v1933_v36 = vmov 0.0  }
 0x144   :  { %958 = vmatpush1.bf16.msra.mxu0 %v1710_v39  ;;  %1538 = vmatpush3.bf16.msra.mxu1 %v1714_v40 }
 0x145   :  { %959 = vmatprep.subr.bf16.mxu0 %v1717_v41  ;;  %1539 = vmatprep.subr.bf16.mxu1 %v1718_v42 }
 0x148   :  { %960 = vmatpush1.bf16.msra.mxu0 %v1715_v44  ;;  %1540 = vmatpush3.bf16.msra.mxu1 %v1719_v45  ;;  %v396_v44 = vrot.slane %v383_v43, %v106_v38 }
 0x149   :  { %961 = vmatprep.subr.bf16.mxu0 %v1722_v46  ;;  %1541 = vmatprep.subr.bf16.mxu1 %v1723_v47 }
 0x14c   :  { %962 = vmatpush1.bf16.msra.mxu0 %v1720_v49  ;;  %1542 = vmatpush3.bf16.msra.mxu1 %v1724_v50 }
 0x14d   :  { %963 = vmatprep.subr.bf16.mxu0 %v1727_v51  ;;  %1543 = vmatprep.subr.bf16.mxu1 %v1728_v52  ;;  %v388_v52 = vrot.slane %v383_v43, %v98_v6  ;;  %v1781_v6 = vld [vmem:[#allocation9 + $0x88] sm:$0xff]  }
 0x150   :  { %964 = vmatpush1.bf16.msra.mxu0 %v1725_v53  ;;  %1544 = vmatpush3.bf16.msra.mxu1 %v1729_v54  ;;  %v392_v53 = vrot.slane %v383_v43, %v102_v8  ;;  %v1783_v8 = vld [vmem:[#allocation9 + $0x98] sm:$0xff]  }
 0x151   :  { %965 = vmatprep.subr.bf16.mxu0 %v1732_v55  ;;  %1545 = vmatprep.subr.bf16.mxu1 %v1733_v56 }
 0x154   :  { %966 = vmatpush1.bf16.msra.mxu0 %v1730_v57  ;;  %1546 = vmatpush3.bf16.msra.mxu1 %v1734_v58 }
 0x155   :  { %967 = vmatprep.subr.bf16.mxu0 %v1737_v59  ;;  %1547 = vmatprep.subr.bf16.mxu1 %v1738_v60 }
 0x158   :  { %968 = vmatpush1.bf16.msra.mxu0 %v1735_v62  ;;  %1548 = vmatpush3.bf16.msra.mxu1 %v1739_v63  ;;  %v1780_v62 = vld [vmem:[#allocation9 + $0x80] sm:$0xff]  }
 0x159   :  { %969 = vmatprep.subr.bf16.mxu0 %v1742_v0  ;;  %1555 = vmatprep.subr.bf16.mxu1 %v1764_v20  ;;  %v1784_v0 = vld [vmem:[#allocation9 + $0xa0] sm:$0xff]  }
 0x15b   :  { %1067 = vmatmul.mubr.bf16.vlgmr.msra.gmra.mrb[8].mxu1 %v253_v1 }
 0x15c   :  { %970 = vmatpush1.bf16.msra.mxu0 %v1740_v2  ;;  %1556 = vmatpush3.bf16.msra.mxu1 %v1765_v21  ;;  %v1786_v2 = vld [vmem:[#allocation9 + $0xb0] sm:$0xff]   ;;  %v1360_v21 = vstv %s2071_s0 }
 0x15d   :  { %971 = vmatprep.subr.bf16.mxu0 %v1745_v3  ;;  %1557 = vmatprep.subr.bf16.mxu1 %v1766_v22  ;;  %v1787_v3 = vld [vmem:[#allocation9 + $0xb8] sm:$0xff]  }
 0x160   :  { %972 = vmatpush1.bf16.msra.mxu0 %v1743_v4  ;;  %1558 = vmatpush3.bf16.msra.mxu1 %v1767_v23 }
 0x161   :  { %973 = vmatprep.subr.bf16.mxu0 %v1748_v7  ;;  %1559 = vmatprep.subr.bf16.mxu1 %v1768_v24 }
 0x164   :  { %974 = vmatpush1.bf16.msra.mxu0 %v1746_v9  ;;  %1560 = vmatpush3.bf16.msra.mxu1 %v1769_v25 }
 0x165   :  { %975 = vmatprep.subr.bf16.mxu0 %v1751_v10  ;;  %1561 = vmatprep.subr.bf16.mxu1 %v1770_v26 }
 0x168   :  { %976 = vmatpush1.bf16.msra.mxu0 %v1749_v11  ;;  %1562 = vmatpush3.bf16.msra.mxu1 %v1771_v27 }
 0x169   :  { %977 = vmatprep.subr.bf16.mxu0 %v1754_v12  ;;  %1563 = vmatprep.subr.bf16.mxu1 %v1772_v28 }
 0x16c   :  { %978 = vmatpush1.bf16.msra.mxu0 %v1752_v13  ;;  %1564 = vmatpush3.bf16.msra.mxu1 %v1773_v29 }
 0x16d   :  { %979 = vmatprep.subr.bf16.mxu0 %v1757_v14  ;;  %1565 = vmatprep.subr.bf16.mxu1 %v1774_v30  ;;  %v1486_v14 = vld [vmem:[%s2078_s7] ss:$0 sm:$0xff] }
 0x170   :  { %980 = vmatpush1.bf16.msra.mxu0 %v1755_v15  ;;  %1566 = vmatpush3.bf16.msra.mxu1 %v1775_v31 }
 0x171   :  { %981 = vmatprep.subr.bf16.mxu0 %v1760_v16  ;;  %1567 = vmatprep.subr.bf16.mxu1 %v1776_v32 }
 0x174   :  { %982 = vmatpush1.bf16.msra.mxu0 %v1758_v17  ;;  %1568 = vmatpush3.bf16.msra.mxu1 %v1777_v33 }
 0x175   :  { %983 = vmatprep.subr.bf16.mxu0 %v1763_v18  ;;  %1569 = vmatprep.subr.bf16.mxu1 %v1778_v34 }
 0x178   :  { %984 = vmatpush1.bf16.msra.mxu0 %v1761_v19  ;;  %1570 = vmatpush3.bf16.msra.mxu1 %v1779_v35 }
 0x179   :  { %1586 = vmatprep.subr.bf16.mxu1 %v1933_v36 }
 0x17b   :  { %986 = vmatmul.mubr.bf16.vlgmr.msra.gmra.mrb[4].mxu0 %v253_v1  ;;  %v1785_v1 = vld [vmem:[#allocation9 + $0xa8] sm:$0xff]  }
 0x20e   :  { %v1527_v37 = vpop.f32.mrb[4].mxu1 }
 0x20f   :  { %v1528_v39 = vpop.f32.mrb[5].mxu1 }
 0x210   :  { %v1529_v40 = vadd.f32 %v1528_v39, %v1527_v37  ;;  %v1530_v41 = vpop.f32.mrb[6].mxu1 }
 0x211   :  { %v1531_v42 = vpop.f32.mrb[7].mxu1 }
 0x212   :  { %v1029_v47 = vadd.f32 %v1529_v40, %v396_v44 }
 0x22e   :  { %v1549_v45 = vpop.f32.mrb[8].mxu1 }
 0x22f   :  { %v1550_v46 = vpop.f32.mrb[9].mxu1 }
 0x230   :  { %v1551_v48 = vadd.f32 %v1550_v46, %v1549_v45  ;;  %v1552_v49 = vpop.f32.mrb[10].mxu1 }
 0x231   :  { %v1553_v50 = vpop.f32.mrb[11].mxu1 }
 0x232   :  { %v1069_v51 = vadd.f32 %v1551_v48, %v1029_v47 }
 0x24e   :  { %v987_v54 = vpop.f32.mrb[4].mxu0 }
 0x24f   :  { %v1606_v55 = vadd.f32 %v987_v54, %v388_v52  ;;  %v989_v56 = vpop.f32.mrb[5].mxu0 }
 0x250   :  { %v1607_v57 = vadd.f32 %v989_v56, %v392_v53  ;;  %v991_v58 = vpop.f32.mrb[6].mxu0 }
 0x251   :  { %1796 = vtanh.f32 %v1606_v55  ;;  %v992_v38 = vpop.f32.mrb[7].mxu0 }
 0x252   :  { %1798 = vtanh.f32 %v1607_v57 }
 0x253   :  { %1800 = vtanh.f32 %v1069_v51 }
 0x25b   :  { %v1797_v59 = vpop.eup %1796 }
 0x25c   :  { %v1799_v60 = vpop.eup %1798  ;;  %v1077_v63 = vpack.c.bf16 %v1797_v59, %v1797_v59 }
 0x25d   :  { %v1078_v61 = vpack.c.bf16 %v1799_v60, %v1799_v60  ;;  %v1801_v4 = vpop.eup %1800 }
 0x25e   :  { %v1079_v7 = vpack.c.bf16 %v1801_v4, %v1801_v4 }
 0x25f   :  { %1311 = vmatprep.mubr.bf16.mxu1 %v1078_v61 }
 0x260   :  { %1312 = vmatmul.mubr.bf16.vlgmr.msra.gmra.mrb[12].mxu1 %v1077_v63 }
 0x261   :  { %1587 = vmatpush3.bf16.msra.mxu1 %v1780_v62  ;;  %1602 = vmatprep.mubr.msk.bf16.mxu1 %vm1934_vm2, %v1933_v36 }
 0x262   :  { %1588 = vmatprep.subr.bf16.mxu1 %v1933_v36 }
 0x265   :  { %1589 = vmatpush3.bf16.msra.mxu1 %v1781_v6 }
 0x266   :  { %1590 = vmatprep.subr.bf16.mxu1 %v1933_v36 }
 0x269   :  { %1591 = vmatpush3.bf16.msra.mxu1 %v1782_v5 }
 0x26a   :  { %1592 = vmatprep.subr.bf16.mxu1 %v1933_v36 }
 0x26d   :  { %1593 = vmatpush3.bf16.msra.mxu1 %v1783_v8 }
 0x26e   :  { %1594 = vmatprep.subr.bf16.mxu1 %v1933_v36 }
 0x271   :  { %1595 = vmatpush3.bf16.msra.mxu1 %v1784_v0 }
 0x272   :  { %1596 = vmatprep.subr.bf16.mxu1 %v1933_v36 }
 0x275   :  { %1597 = vmatpush3.bf16.msra.mxu1 %v1785_v1 }
 0x276   :  { %1598 = vmatprep.subr.bf16.mxu1 %v1933_v36 }
 0x279   :  { %1599 = vmatpush3.bf16.msra.mxu1 %v1786_v2 }
 0x27a   :  { %1600 = vmatprep.subr.bf16.mxu1 %v1933_v36 }
 0x27d   :  { %1601 = vmatpush3.bf16.msra.mxu1 %v1787_v3 }
 0x280   :  { %1603 = vmatmul.mubr.bf16.vlgmr.msra.gmra.mrb[16].mxu1 %v1079_v7 }
 0x333   :  { %v1571_v9 = vpop.f32.mrb[12].mxu1 }
 0x334   :  { %v1572_v10 = vpop.f32.mrb[13].mxu1 }
 0x335   :  { %v1573_v11 = vadd.f32 %v1572_v10, %v1571_v9  ;;  %v1574_v12 = vpop.f32.mrb[14].mxu1 }
 0x336   :  { %v1575_v13 = vpop.f32.mrb[15].mxu1 }
 0x337   :  { %v1314_v15 = vadd.f32 %v1573_v11, %v1486_v14 }
 0x353   :  { %v1353_v16 = vpop.f32.mrb[16].mxu1 }
 0x354   :  { %v1354_v17 = vadd.f32 %v1353_v16, %v1314_v15  ;;  %v1604_v18 = vpop.f32.mrb[17].mxu1 }
 0x355   :  { %v1356_v19 = vpop.f32.mrb[18].mxu1 }
 0x356   :  { %1802 = vtanh.f32 %v1354_v17  ;;  %v1605_v20 = vpop.f32.mrb[19].mxu1 }
 0x360   :  { %v1803_v22 = vpop.eup %1802 }
 0x361   :  { %v1361_v23 = vmul.f32 %v1803_v22, %v1360_v21 }
 0x363   :  { %1362 = vst [vmem:[#allocation11] sm:$0xff] %v1361_v23 }
 0x364   :  { %1903 = shalt.err (!%p1900_p8)
}
 0x365   :  { %s1904_s19 = scalar_lea.hbm %s2079_s8, 128 }
 0x366   :  { %p1905_p9 = scmp.ne.s32.totalorder %s2079_s8, %s1904_s19  ;;  %p1908_p10 = scmp.lt.u32.totalorder %s1904_s19, %s2079_s8 }
 0x368   :  { %p1910_p11 = pnand %p1908_p10, %p1905_p9 }
 0x36a   :  { %1913 = shalt.err (!%p1910_p11)
}
 0x36b   :  { %1372 = dma.vmem_to_hbm [thread:$0]  %s1370_s17, 128, %s2079_s8, [#allocation5]  }
 0x36c   :  { %1920 = dma.done.wait [#allocation5], 128  }
 0x36d   :  { %1921 = vsyncadd [#allocation5], 4294967168 }
 0x36e   :  { %1376 = vsyncpa [#allocation4], 1 }
 0x36f   :  { %1377 = vsyncpa [#allocation7], 1 }
 0x370   :  { %1378 = vsyncpa [#allocation10], 1 }
 0x371   :  { %1379 = vsyncpa [#allocation5], 1 }

</bundles_post_ra>
